<compile_context>
chip_gen: v7x
topology: tpu7x:2x2x1
jax: 0.10.0
libtpu: 0.0.40
codegen_flags: <defaults>
</compile_context>

<pallas_src>
import functools
import math

import jax
import jax.numpy as jnp
import numpy as np
from jax.experimental import pallas as pl
from jax.experimental.pallas import tpu as pltpu


# ------------------------------------------------------------------ PE table
def make_positional_encoding_2d(embed_dim: int, max_len: int = 5000):
    """Deterministic __init__-equivalent: build the (max_len, embed_dim) sinusoid table."""
    if embed_dim % 2 != 0:
        raise ValueError(f"embed_dim must be even, got {embed_dim}")
    position = jnp.arange(0, max_len, dtype=jnp.float32)[:, None]            # (max_len, 1)
    div_term = jnp.exp(
        jnp.arange(0, embed_dim, 2, dtype=jnp.float32)
        * (-math.log(10000.0) / embed_dim)
    )                                                                        # (E//2,)
    angles = position * div_term                                             # (max_len, E//2)
    pe = jnp.zeros((max_len, embed_dim), dtype=jnp.float32)
    pe = pe.at[:, 0::2].set(jnp.sin(angles))
    pe = pe.at[:, 1::2].set(jnp.cos(angles))
    return pe                                                                # (max_len, E)


# ------------------------------------------------------------------ kernels
def _pe_add_4d_kernel(x_ref, pe_ref, o_ref):
    # x_ref: (1, TL, N, E), pe_ref: (TL, E); pe broadcast over the table dim N in VMEM.
    o_ref[...] = (x_ref[...] + pe_ref[...][None, :, None, :]).astype(o_ref.dtype)


def _pe_add_flat_kernel(x_ref, pe_ref, o_ref, *, n_tables: int):
    # x_ref: (1, TL, N*E), pe_ref: (TL, E).  Replicate pe across the N tables inside
    # VMEM (lane tiling on the XLU/VPU is free for an HBM-bound add) instead of
    # materializing an (L, N*E) pe in HBM.
    pe_rep = jnp.tile(pe_ref[...], (1, n_tables))                            # (TL, N*E)
    o_ref[...] = (x_ref[...] + pe_rep[None, :, :]).astype(o_ref.dtype)


# ------------------------------------------------------------------ sizing helpers
def _vmem_budget():
    """(target x-block bytes, scoped vmem limit) picked per TPU generation."""
    cap = None
    try:
        cap = getattr(pltpu.get_tpu_info(), "vmem_capacity_bytes", None)
    except Exception:
        cap = None
    if cap is None:
        return 4 * 1024 * 1024, 48 * 1024 * 1024          # unknown part: conservative
    if cap >= 100 * 1024 * 1024:                          # v5e / v6e: 128 MiB VMEM
        # ~5 live block-sized buffers (2 in + 2 out + broadcast temp) -> ~60 MiB < 80 MiB.
        return 12 * 1024 * 1024, 80 * 1024 * 1024
    # v7x: 64 MiB VMEM, 3.2 TB/s -> bigger blocks amortize the ~0.35 us step overhead,
    # but 5 * 8 MiB must stay under the 48 MiB scoped limit.
    return 8 * 1024 * 1024, 48 * 1024 * 1024


def _choose_tl(L: int, row_bytes: int, target_bytes: int, batch: int) -> int:
    """Sequence-tile size: ~target_bytes per block, sublane-aligned (mult of 8 or == L),
    and at least 2 total grid steps when L allows so both v7x TensorCores stream."""
    tl = max(1, target_bytes // max(row_bytes, 1))
    if tl < L:
        tl = max(8, (tl // 8) * 8)
    tl = min(tl, L)
    if batch * pl.cdiv(L, tl) < 2 and L >= 16:
        tl = max(8, ((L // 2) // 8) * 8)
    return tl


# ------------------------------------------------------------------ wrapper
def positional_encoding_2d_forward(x: jnp.ndarray, pe: jnp.ndarray, *, donate_x: bool = False):
    """x: (B, L, N, E), pe: (max_len, E).  Returns x + pe[:L] broadcast over B and N.

    Output dtype follows torch type promotion (e.g. bf16 x + f32 pe -> f32 out).
    """
    B, L, N, E = x.shape
    max_len = pe.shape[0]
    if L > max_len:
        raise ValueError(f"sequence length L={L} exceeds positional-encoding max_len={max_len}")

    out_dtype = jnp.promote_types(x.dtype, pe.dtype)
    pe_l = pe[:L].astype(out_dtype)                                          # (L, E) glue slice
    x_item = jnp.dtype(x.dtype).itemsize
    out_item = jnp.dtype(out_dtype).itemsize

    target_block_bytes, vmem_limit_bytes = _vmem_budget()
    compiler_params = pltpu.CompilerParams(
        dimension_semantics=("parallel", "parallel"),
        vmem_limit_bytes=vmem_limit_bytes,
    )
    cost = pl.CostEstimate(
        flops=B * L * N * E,
        transcendentals=0,
        # pe is DMA'd once per L-tile (elided across the inner B axis) -> ~L*E bytes.
        bytes_accessed=B * L * N * E * (x_item + out_item) + L * E * out_item,
    )
    # Aliasing only legal when the output has the same shape/dtype as the donated input.
    io_aliases = {0: 0} if (donate_x and out_dtype == jnp.dtype(x.dtype)) else {}

    # NOTE: when L % TL != 0 the last pe block reads past row L (Pallas pads); those
    # values are never written because the matching output rows are masked.

    if E % 128 == 0 and N % 8 == 0:
        # Natively lane- AND sublane-dense: keep the 4-D layout, pe stays (TL, E).
        row_bytes = N * E * out_item
        TL = _choose_tl(L, row_bytes, target_block_bytes, B)
        grid = (pl.cdiv(L, TL), B)       # B innermost -> pe block index constant, DMA elided
        return pl.pallas_call(
            _pe_add_4d_kernel,
            out_shape=jax.ShapeDtypeStruct((B, L, N, E), out_dtype),
            grid_spec=pltpu.PrefetchScalarGridSpec(
                num_scalar_prefetch=0,
                grid=grid,
                in_specs=[
                    pl.BlockSpec((1, TL, N, E), lambda lt, b: (b, lt, 0, 0)),
                    pl.BlockSpec((TL, E), lambda lt, b: (lt, 0)),
                ],
                out_specs=pl.BlockSpec((1, TL, N, E), lambda lt, b: (b, lt, 0, 0)),
            ),
            compiler_params=compiler_params,
            cost_estimate=cost,
            input_output_aliases=io_aliases,
        )(x, pe_l)

    NE = N * E
    if NE % 128 == 0:
        # Flatten (N, E) -> N*E so the output last dim is lane-dense (unmasked vst) and
        # sublanes stay dense even for small N.  pe is replicated in-kernel, not in HBM.
        x_flat = x.reshape(B, L, NE)
        row_bytes = NE * out_item
        TL = _choose_tl(L, row_bytes, target_block_bytes, B)
        grid = (pl.cdiv(L, TL), B)       # B innermost -> pe block index constant, DMA elided
        out = pl.pallas_call(
            functools.partial(_pe_add_flat_kernel, n_tables=N),
            out_shape=jax.ShapeDtypeStruct((B, L, NE), out_dtype),
            grid_spec=pltpu.PrefetchScalarGridSpec(
                num_scalar_prefetch=0,
                grid=grid,
                in_specs=[
                    pl.BlockSpec((1, TL, NE), lambda lt, b: (b, lt, 0)),
                    pl.BlockSpec((TL, E), lambda lt, b: (lt, 0)),
                ],
                out_specs=pl.BlockSpec((1, TL, NE), lambda lt, b: (b, lt, 0)),
            ),
            compiler_params=compiler_params,
            cost_estimate=cost,
            input_output_aliases=io_aliases,
        )(x_flat, pe_l)
        return out.reshape(B, L, N, E)

    # TODO(synk): no lane-dense Pallas layout when N*E is not a multiple of 128;
    # fall back to the (still correct, still HBM-bound) fused XLA broadcast-add.
    return x.astype(out_dtype) + pe_l[None, :, None, :]


# ------------------------------------------------------------------ self-test
if __name__ == "__main__":
    key = jax.random.PRNGKey(0)
    k1, k2, k3 = jax.random.split(key, 3)

    # Case 1: small E (32) -> flattened lane-dense path (N*E = 128), pe tiled in VMEM.
    B, L, N, E = 2, 8, 4, 32
    x1 = jax.random.normal(k1, (B, L, N, E), dtype=jnp.float32)
    pe1 = make_positional_encoding_2d(E, max_len=16)
    out1 = jax.block_until_ready(positional_encoding_2d_forward(x1, pe1))
    ref1 = x1 + pe1[:L][None, :, None, :]
    np.testing.assert_allclose(np.asarray(out1), np.asarray(ref1), rtol=1e-6, atol=1e-6)

    # Case 2: E multiple of 128 and N % 8 == 0 -> native 4-D path with in-kernel N broadcast.
    B2, L2, N2, E2 = 2, 16, 8, 128
    x2 = jax.random.normal(k2, (B2, L2, N2, E2), dtype=jnp.float32)
    pe2 = make_positional_encoding_2d(E2, max_len=32)
    out2 = jax.block_until_ready(positional_encoding_2d_forward(x2, pe2))
    ref2 = x2 + pe2[:L2][None, :, None, :]
    np.testing.assert_allclose(np.asarray(out2), np.asarray(ref2), rtol=1e-6, atol=1e-6)

    # Case 3: E multiple of 128 but N < 8 (sublane padding) -> routed to the flat path;
    # bf16 input exercises the torch-style promotion to float32.
    B3, L3, N3, E3 = 1, 16, 4, 128
    x3 = jax.random.normal(k3, (B3, L3, N3, E3), dtype=jnp.bfloat16)
    pe3 = make_positional_encoding_2d(E3, max_len=32)
    out3 = jax.block_until_ready(positional_encoding_2d_forward(x3, pe3))
    assert out3.dtype == jnp.float32
    ref3 = x3.astype(jnp.float32) + pe3[:L3][None, :, None, :]
    np.testing.assert_allclose(np.asarray(out3), np.asarray(ref3), rtol=1e-6, atol=1e-6)

    print("KERNEL_OK")
</pallas_src>

<mosaic_0001>
module attributes {stable_mosaic.version = 11 : i64} {
  func.func @_pe_add_flat_kernel(%arg0: i32, %arg1: i32, %arg2: memref<1x8x128xf32, #tpu.memory_space<vmem>>, %arg3: memref<8x32xf32, #tpu.memory_space<vmem>>, %arg4: memref<1x8x128xf32, #tpu.memory_space<vmem>>) attributes {dimension_semantics = [#tpu.dimension_semantics<parallel>, #tpu.dimension_semantics<parallel>], iteration_bounds = array<i64: 1, 2>, scalar_prefetch = 0 : i64, scratch_operands = 0 : i64, tpu.core_type = #tpu.core_type<tc>, window_params = [{transform_indices = @transform_0, window_bounds = array<i64: 1, 8, 128>}, {transform_indices = @transform_1, window_bounds = array<i64: 8, 32>}, {transform_indices = @transform_2, window_bounds = array<i64: 1, 8, 128>}]} {
    %c0 = arith.constant 0 : index
    %c0_0 = arith.constant 0 : index
    %0 = vector.load %arg3[%c0, %c0_0] : memref<8x32xf32, #tpu.memory_space<vmem>>, vector<8x32xf32>
    %1 = tpu.concatenate %0, %0, %0, %0 in 1 : vector<8x32xf32>, vector<8x32xf32>, vector<8x32xf32>, vector<8x32xf32> -> vector<8x128xf32>
    %c0_1 = arith.constant 0 : index
    %c0_2 = arith.constant 0 : index
    %c0_3 = arith.constant 0 : index
    %2 = vector.load %arg2[%c0_1, %c0_2, %c0_3] : memref<1x8x128xf32, #tpu.memory_space<vmem>>, vector<1x8x128xf32>
    %3 = vector.shape_cast %1 : vector<8x128xf32> to vector<1x8x128xf32>
    %4 = arith.addf %2, %3 : vector<1x8x128xf32>
    %c0_4 = arith.constant 0 : index
    %c0_5 = arith.constant 0 : index
    %c0_6 = arith.constant 0 : index
    %5 = vector.load %arg4[%c0_4, %c0_5, %c0_6] : memref<1x8x128xf32, #tpu.memory_space<vmem>>, vector<1x8x128xf32>
    tpu.vector_store %arg4[%c0_4, %c0_5, %c0_6], %4 {strides = array<i32>} : memref<1x8x128xf32, #tpu.memory_space<vmem>>, vector<1x8x128xf32>,
    return
  }
  func.func @transform_0(%arg0: i32, %arg1: i32) -> (i32, i32, i32) {
    %c0_i32 = arith.constant 0 : i32
    %c0_i32_0 = arith.constant 0 : i32
    return %arg1, %arg0, %c0_i32 : i32, i32, i32
  }
  func.func @transform_1(%arg0: i32, %arg1: i32) -> (i32, i32) {
    %c0_i32 = arith.constant 0 : i32
    %c0_i32_0 = arith.constant 0 : i32
    return %arg0, %c0_i32 : i32, i32
  }
  func.func @transform_2(%arg0: i32, %arg1: i32) -> (i32, i32, i32) {
    %c0_i32 = arith.constant 0 : i32
    %c0_i32_0 = arith.constant 0 : i32
    return %arg1, %arg0, %c0_i32 : i32, i32, i32
  }
}

</mosaic_0001>

<bundles_post_ra>
// kernel: tpu_custom_call.1
= control target key start
LH: loop header
LB: loop body
LE: loop exit
PB: predicated region body
PF: predicated region fallthrough
CT: control target
= control target key end

     0   :  { %7 = vsyncpa [#allocation3], 0  ;;  %s797_s0 = inlined_call_operand.hbm [shape: f32[2,8,128], index: 0, kind: input, shape index: {}]   ;;  %s798_s1 = inlined_call_operand.hbm [shape: f32[8,32], index: 1, kind: input, shape index: {}]   ;;  %s799_s2 = inlined_call_operand.hbm [shape: f32[2,8,128], index: 2, kind: output, shape index: {}]  }
   0x1   :  { %9 = vsyncpa [#allocation3 + $0x1], 0 }
   0x2   :  { %10 = vsyncpa [#allocation6], 0 }
   0x3   :  { %11 = vsyncpa [#allocation4], 0 }
   0x4   :  { %13 = vsyncpa [#allocation4 + $0x1], 0  ;;  %s581_s9 = smov 0   ;;  %s583_s10 = smov 0  }
   0x5   :  { %s585_s11 = smov 0   ;;  %s587_s12 = smov 0  }
   0x6   :  { %s589_s13 = smov 0   ;;  %s591_s14 = smov 0  }
   0x7 LB: > { %s323_s15 = sadd.s32 4294967295, %s558_s14   ;;  %s324_s16 = sadd.s32 4294967294, %s558_s14   ;;  %s558_s14 = sphi %s591_s14, %s19_s14   ;;  %s554_s13 = sphi %s589_s13, %s824_s13   ;;  %s550_s12 = sphi %s587_s12, %s823_s12   ;;  %s546_s11 = sphi %s585_s11, %s822_s11   ;;  %s542_s10 = sphi %s583_s10, %s821_s10   ;;  %s538_s9 = sphi %s581_s9, %s820_s9  }
   0x8   : > { %p53_p0 = scmp.ne.s32.totalorder %s542_s10, %s538_s9  ;;  %p615_p1 = scmp.eq.s32.totalorder %s323_s15, 0 }
   0x9   : > { %p619_p2 = scmp.eq.s32.totalorder %s323_s15, 1  ;;  %p111_p3 = scmp.eq.s32.totalorder %s324_s16, 1 }
   0xa   : > { %s804_s17 = scalar_select %p615_p1, 1, 0 }
   0xb   : > { %s805_s18 = scalar_select %p619_p2, 1, 0 }
   0xc   : > { %p625_p4 = por %p615_p1, %p53_p0  ;;  %p325_p5 = scmp.ge.s32.totalorder %s558_s14, 1 }
   0xd   : > { %p630_p6 = por %p111_p3, %p53_p0  ;;  %p118_p7 = scmp.lt.s32.totalorder %s558_s14, 3 }
   0xe   : > { %s806_s19 = scalar_select %p625_p4, 1, 0 }
   0xf   : > { %s807_s20 = scalar_select %p630_p6, 1, 0 }
  0x10   : > { %p635_p8 = pnand %p325_p5, %p118_p7  ;;  %s560_s22 = smov [#allocation5]  }
  0x11   : > { %s133_s23 = sshll.u32 %s560_s22, 4  ;;  %s28_s25 = sadd.s32 1, %s554_s13  ;;  %s134_s23 = int_to_ptr.vmem [resolvable:$true] %s133_s23 }
  0x12   : > { %s808_s21 = scalar_select %p635_p8, 1, 0 }
  0x13   : > { %p346_p10 = pneg %p635_p8  ;;  %s40_s26 = sadd.s32 1, %s546_s11 }
  0x14   : > { %p650_p12 = scmp.ge.s32.totalorder %s28_s25, 2  ;;  %s414_s30 = scalar_lea.hbm %s798_s1, 128 }
  0x15   : > { %p644_p11 = pnand %p346_p10, %p615_p1  ;;  %p415_p13 = scmp.ne.s32.totalorder %s798_s1, %s414_s30 }
  0x16   : > { %s810_s27 = scalar_select %p650_p12, 1, 0 }
  0x17   : > { %p416_p0 = pneg %p644_p11  ;;  %p421_p7 = scmp.lt.u32.totalorder %s414_s30, %s798_s1 }
  0x19   : > { %p417_p3 = pnand %p416_p0, %p415_p13 }
  0x1b   : > { %p418_p5 = pneg %p417_p3 }
  0x1d   : > { %p423_p10 = pnand %p421_p7, %p418_p5 }
  0x1f   : > { %426 = shalt.err (!%p423_p10)
}
  0x20   : > { %s427_s7 = scalar_lea.vmem %s134_s23, 128  ;;  %p435_p4 = scmp.lt.s32.totalorder %s134_s23, %s134_s23 }
  0x21   : > { %p428_p9 = scmp.ne.s32.totalorder %s134_s23, %s427_s7  ;;  %p436_p8 = scmp.lt.s32.totalorder %s427_s7, %s427_s7 }
  0x23   : > { %p430_p6 = pnand %p428_p9, %p416_p0  ;;  %p437_p2 = por %p436_p8, %p435_p4 }
  0x25   : > { %p431_p1 = pneg %p430_p6 }
  0x27   : > { %p438_p12 = pnand %p437_p2, %p431_p1 }
  0x29   : > { %441 = shalt.err (!%p438_p12)
}
  0x2a   : > { %349 = dma.hbm_to_vmem [thread:$0]  (!%p644_p11), %s798_s1, 128, %s134_s23, [#allocation6]  }
  0x2b   : > { %p811_p4 = scmp.ne.s32.totalorder %s810_s27, 0  ;;  %p47_p1 = scmp.ne.s32.totalorder %s546_s11, %s542_s10 }
  0x2c   : > { %p48_p2 = scmp.eq.s32.totalorder %s558_s14, 0  ;;  %p359_p6 = scmp.lt.s32.totalorder %s558_s14, 2 }
  0x2d   : > { %s826_s25 = smov (%p811_p4, %s28_s25), 0  ;;  %p812_p12 = scmp.ne.s32.totalorder %s805_s18, 0 }
  0x2e   : > { %s35_s16 = ssub.s32 %s554_s13, %s826_s25  ;;  %p49_p9 = por %p48_p2, %p47_p1 }
  0x2f   : > { %p38_p8 = scmp.eq.s32.totalorder %s35_s16, 0  ;;  %p682_p13 = por %p812_p12, %p47_p1 }
  0x30   : > { %s144_s24 = sand.u32 1, %s546_s11   ;;  %s329_s27 = sshll.u32 %s554_s13, 7 }
  0x31   : > { %s690_s28 = scalar_select %p38_p8, %s546_s11, %s40_s26  }
  0x32   : > { %s328_s23 = sshll.u32 %s144_s24, 3  ;;  %s696_s3 = scalar_lea.hbm %s797_s0, %s329_s27 }
  0x33   : > { %s148_s18 = scalar_lea.vmem [#allocation2], %s328_s23  ;;  %p700_p11 = pnand %p359_p6, %p49_p9 }
  0x34   : > { %s156_s4 = sshll.u32 %s148_s18, 4  ;;  %s145_s26 = scalar_lea.sflag [#allocation3], %s144_s24  ;;  %s698_s4 = int_to_ptr.vmem [resolvable:$true] %s156_s4 }
  0x35   : > { %s442_s6 = scalar_lea.hbm %s696_s3, 128  ;;  %p444_p3 = pneg %p700_p11 }
  0x36   : > { %p443_p0 = scmp.ne.s32.totalorder %s696_s3, %s442_s6  ;;  %s447_s15 = scalar_lea.hbm %s797_s0, 256 }
  0x37   : > { %p448_p10 = scmp.lt.u32.totalorder %s696_s3, %s797_s0  ;;  %p449_p4 = scmp.lt.u32.totalorder %s447_s15, %s442_s6 }
  0x38   : > { %p445_p5 = pnand %p444_p3, %p443_p0  ;;  %p451_p2 = scmp.lt.u32.totalorder %s442_s6, %s696_s3 }
  0x39   : > { %p450_p1 = por %p449_p4, %p448_p10 }
  0x3a   : > { %p446_p7 = pneg %p445_p5 }
  0x3b   : > { %p452_p6 = por %p451_p2, %p450_p1 }
  0x3d   : > { %p453_p8 = pnand %p452_p6, %p446_p7 }
  0x3f   : > { %456 = shalt.err (!%p453_p8)
}
  0x40   : > { %s457_s24 = scalar_lea.vmem %s698_s4, 128  ;;  %s561_s27 = smov [#allocation2]  }
  0x41   : > { %p458_p9 = scmp.ne.s32.totalorder %s698_s4, %s457_s24  ;;  %s462_s29 = sshll.u32 %s561_s27, 4  ;;  %s463_s29 = int_to_ptr.vmem [resolvable:$false] %s462_s29 }
  0x42   : > { %s464_s30 = scalar_lea.vmem %s463_s29, 256  ;;  %p465_p5 = scmp.lt.s32.totalorder %s698_s4, %s463_s29 }
  0x43   : > { %p460_p12 = pnand %p458_p9, %p444_p3  ;;  %p466_p10 = scmp.lt.s32.totalorder %s464_s30, %s457_s24 }
  0x45   : > { %p461_p0 = pneg %p460_p12  ;;  %p467_p4 = por %p466_p10, %p465_p5 }
  0x47   : > { %p468_p1 = pnand %p467_p4, %p461_p0 }
  0x49   : > { %471 = shalt.err (!%p468_p1)
}
  0x4a   : > { %353 = dma.hbm_to_vmem [thread:$0]  (!%p700_p11), %s696_s3, 128, %s698_s4, %s145_s26  }
  0x4b   : > { %p815_p7 = scmp.ne.s32.totalorder %s808_s21, 0 }
  0x4c   : > { %s732_s18 = sand.u32 (!%p815_p7), 1, %s542_s10   ;;  %p816_p3 = scmp.ne.s32.totalorder (!%p815_p7), %s806_s19, 0 }
  0x4d   : > { %165 = sbr.rel (%p815_p7) target bundleno = 226 (0xe2), region = 28  ;;  %s331_s6 = sshll.u32 (!%p815_p7), %s732_s18, 3 }
  0x4e   : > { %s168_s7 = scalar_lea.sflag (!%p815_p7), [#allocation3], %s732_s18  ;;  %s171_s8 = scalar_lea.vmem (!%p815_p7), [#allocation2], %s331_s6 }
  0x54   : > { %525 = dma.done.wait (%p816_p3), %s168_s7, 128  }
  0x55   : > { %527 = vsyncadd (%p816_p3), %s168_s7, 4294967168  ;;  %p817_p2 = scmp.ne.s32.totalorder %s804_s17, 0 }
  0x57   : > { %529 = dma.done.wait (%p817_p2), [#allocation6], 128  }
  0x58   : > { %531 = vsyncadd (%p817_p2), [#allocation6], 4294967168  ;;  %v196_v0 = vld [vmem:[#allocation5] sm:$0xff]  ;;  %s562_s21 = smov 32   ;;  %s563_s3 = smov 96   ;;  %vm207_vm0 = vcmask 261120  }
  0x59   : > { %198 = vrot.lane.b32.xlu0 %v196_v0, %s562_s21  ;;  %204 = vrot.lane.b32.xlu1 %v196_v0, %s563_s3  ;;  %s564_s4 = smov 64   ;;  %vm209_vm1 = vcmask 523264   ;;  %vm211_vm2 = vcmask 785408   ;;  %v213_v5 = vld [vmem:[%s171_s8] sm:$0xff]  ;;  %s335_s17 = sshll.u32 %s550_s12, 7 }
  0x5a   : > { %s195_s19 = scalar_lea.vmem [#allocation7], %s331_s6  ;;  %s748_s16 = scalar_lea.hbm %s799_s2, %s335_s17 }
  0x5b   : > { %s231_s5 = sshll.u32 %s195_s19, 4  ;;  %s217_s23 = scalar_lea.sflag [#allocation4], %s732_s18  ;;  %s750_s5 = int_to_ptr.vmem [resolvable:$true] %s231_s5 }
  0x5c   : > { %s472_s24 = scalar_lea.vmem %s750_s5, 128  ;;  %s565_s12 = smov [#allocation7]  }
  0x5d   : > { %201 = vrot.lane.b32.xlu0 %v196_v0, %s564_s4  ;;  %p473_p11 = scmp.ne.s32.totalorder %s750_s5, %s472_s24  ;;  %s476_s27 = sshll.u32 %s565_s12, 4  ;;  %s477_s27 = int_to_ptr.vmem [resolvable:$false] %s476_s27 }
  0x5e   : > { %s478_s29 = scalar_lea.vmem %s477_s27, 256  ;;  %p479_p9 = scmp.lt.s32.totalorder %s750_s5, %s477_s27 }
  0x5f   : > { %p474_p6 = pnand %p473_p11, %p682_p13  ;;  %p480_p12 = scmp.lt.s32.totalorder %s478_s29, %s472_s24 }
  0x61   : > { %p475_p8 = pneg %p474_p6  ;;  %p481_p0 = por %p480_p12, %p479_p9 }
  0x63   : > { %p482_p5 = pnand %p481_p0, %p475_p8 }
  0xcb   : > { %v199_v1 = vpop.permute.xlu0 %198  ;;  %v205_v2 = vpop.permute.xlu1 %204 }
  0xcc   : > { %v208_v3 = vsel %vm207_vm0, %v196_v0, %v199_v1 }
  0xcf   : > { %v202_v4 = vpop.permute.xlu0 %201 }
  0xd0   : > { %v210_v6 = vsel %vm209_vm1, %v208_v3, %v202_v4 }
  0xd1   : > { %v212_v7 = vsel %vm211_vm2, %v210_v6, %v205_v2 }
  0xd2   : > { %v214_v8 = vadd.f32 %v213_v5, %v212_v7 }
  0xd4   : > { %215 = vst [vmem:[%s195_s19] sm:$0xff] %v214_v8 }
  0xd5   : > { %485 = shalt.err (!%p482_p5)
}
  0xd6   : > { %s486_s30 = scalar_lea.hbm %s748_s16, 128  ;;  %s490_s7 = scalar_lea.hbm %s799_s2, 256 }
  0xd7   : > { %p487_p10 = scmp.ne.s32.totalorder %s748_s16, %s486_s30  ;;  %p491_p7 = scmp.lt.u32.totalorder %s748_s16, %s799_s2 }
  0xd8   : > { %p492_p3 = scmp.lt.u32.totalorder %s490_s7, %s486_s30  ;;  %p494_p11 = scmp.lt.u32.totalorder %s486_s30, %s748_s16 }
  0xd9   : > { %p488_p4 = pnand %p487_p10, %p682_p13 }
  0xda   : > { %p493_p2 = por %p492_p3, %p491_p7 }
  0xdb   : > { %p489_p1 = pneg %p488_p4 }
  0xdc   : > { %p495_p6 = por %p494_p11, %p493_p2 }
  0xde   : > { %p496_p8 = pnand %p495_p6, %p489_p1 }
  0xe0   : > { %499 = shalt.err (!%p496_p8)
}
  0xe1   : > { %344 = dma.vmem_to_hbm [thread:$0]  (%p682_p13), %s750_s5, 128, %s748_s16, %s217_s23  }
  0xe2 PF: > { %s243_s3 = sand.u32 1, %s538_s9   ;;  %p818_p9 = scmp.ne.s32.totalorder %s807_s20, 0 }
  0xe3   : > { %p819_p12 = scmp.ge.s32.totalorder %s558_s14, 2  ;;  %s244_s4 = scalar_lea.sflag [#allocation4], %s243_s3 }
  0xe5   : > { %p355_p0 = pnand %p819_p12, %p818_p9 }
  0xe7   : > { %533 = dma.done.wait (!%p355_p0), %s244_s4, 128  }
  0xe8   : > { %535 = vsyncadd (!%p355_p0), %s244_s4, 4294967168  ;;  %s19_s14 = sadd.s32 1, %s558_s14   ;;  %s820_s9 = smov %s542_s10 }
  0xe9   : > { %p16_p5 = scmp.ge.s32.totalorder %s19_s14, 4   ;;  %s821_s10 = smov %s546_s11 }
  0xea   : > { %s822_s11 = smov %s690_s28  ;;  %s823_s12 = smov %s554_s13 }
  0xeb   : > { %s824_s13 = smov %s826_s25  ;;  %18 = sbr.rel (!%p16_p5) target bundleno = 7 (0x7), region = 78 }
  0xf2   :  { %249 = vsyncpa [#allocation3], 1 }
  0xf3   :  { %251 = vsyncpa [#allocation3 + $0x1], 1 }
  0xf4   :  { %252 = vsyncpa [#allocation6], 1 }
  0xf5   :  { %253 = vsyncpa [#allocation4], 1 }
  0xf6   :  { %255 = vsyncpa [#allocation4 + $0x1], 1 }

</bundles_post_ra>
